<compile_context>
chip_gen: v6e
topology: v6e:2x2x1
jax: 0.10.0
libtpu: 0.0.40
codegen_flags: <defaults>
</compile_context>

<pallas_src>
import math

import jax
import jax.numpy as jnp
from jax.experimental import pallas as pl
from jax.experimental.pallas import tpu as pltpu


def _round_up(a: int, b: int) -> int:
    return ((a + b - 1) // b) * b


def _make_lm_head_kernel(eps: float):
    inv_sqrt2 = 1.0 / math.sqrt(2.0)

    def kernel(x_ref, w1_ref, b1_ref, gamma_ref, beta_ref, w2_ref, b2_ref,
               out_ref, h_ref):
        j = pl.program_id(1)  # vocab-tile index (fastest-varying grid axis)

        # --- transform (dense -> GELU -> LayerNorm), once per row tile ------
        @pl.when(j == 0)
        def _():
            h = jnp.dot(x_ref[...], w1_ref[...],
                        preferred_element_type=jnp.float32)
            h = h + b1_ref[...].astype(jnp.float32)
            # exact (erf-based) GELU, matching HF 'gelu'
            h = 0.5 * h * (1.0 + jax.lax.erf(h * inv_sqrt2))
            # LayerNorm over the hidden dim; statistics kept in f32
            mean = jnp.mean(h, axis=-1, keepdims=True)
            centered = h - mean
            var = jnp.mean(centered * centered, axis=-1, keepdims=True)
            h = centered * jax.lax.rsqrt(var + eps)
            h = (h * gamma_ref[...].astype(jnp.float32)
                 + beta_ref[...].astype(jnp.float32))
            h_ref[...] = h.astype(h_ref.dtype)  # cache for all vocab tiles

        # --- decoder tile: (tile_m, H) @ (H, tile_n) on the MXU --------------
        logits = jnp.dot(h_ref[...], w2_ref[...],
                         preferred_element_type=jnp.float32)
        logits = logits + b2_ref[...].astype(jnp.float32)
        out_ref[...] = logits.astype(out_ref.dtype)

    return kernel


def deberta_lm_prediction_head(x, params, *, eps=1e-7, tile_m=256, tile_n=512,
                               matmul_dtype=None, out_dtype=None):
    """x: (B, S, H). Returns logits (B, S, V)."""
    B, S, H = x.shape
    w1 = params["w_dense"]      # (H, H)  == PyTorch dense.weight.T
    b1 = params["b_dense"]      # (H,)
    gamma = params["ln_gamma"]  # (H,)
    beta = params["ln_beta"]    # (H,)
    w2 = params["w_decoder"]    # (H, V)  == PyTorch decoder.weight.T
    b2 = params["b_decoder"]    # (V,)
    V = w2.shape[1]
    M = B * S

    if matmul_dtype is None:
        matmul_dtype = x.dtype
    if out_dtype is None:
        out_dtype = x.dtype

    # --- M (rows) tiling: clamp tile, zero-pad rows up to a tile multiple ----
    tile_m = max(8, min(tile_m, _round_up(M, 8)))
    M_pad = _round_up(M, tile_m)

    # --- V (vocab) tiling: clamp tile, zero-pad columns to a tile multiple ---
    tile_n = min(tile_n, V)
    V_pad = _round_up(V, tile_n)

    x2d = x.reshape(M, H).astype(matmul_dtype)
    if M_pad != M:
        x2d = jnp.pad(x2d, ((0, M_pad - M), (0, 0)))

    w1c = w1.astype(matmul_dtype)
    b1_2d = b1.reshape(1, H).astype(jnp.float32)
    gamma_2d = gamma.reshape(1, H).astype(jnp.float32)
    beta_2d = beta.reshape(1, H).astype(jnp.float32)

    w2c = w2.astype(matmul_dtype)
    b2_2d = b2.reshape(1, V).astype(jnp.float32)
    if V_pad != V:
        w2c = jnp.pad(w2c, ((0, 0), (0, V_pad - V)))
        b2_2d = jnp.pad(b2_2d, ((0, 0), (0, V_pad - V)))

    grid = (M_pad // tile_m, V_pad // tile_n)

    mm_bytes = jnp.dtype(matmul_dtype).itemsize
    cost = pl.CostEstimate(
        flops=int(2 * M * H * (H + V)),
        transcendentals=int(M * H),  # erf in the GELU
        bytes_accessed=int(
            x2d.size * mm_bytes
            + w1c.size * mm_bytes
            + w2c.size * mm_bytes
            + (b1_2d.size + gamma_2d.size + beta_2d.size + b2_2d.size) * 4
            + M_pad * V_pad * jnp.dtype(out_dtype).itemsize),
    )

    out = pl.pallas_call(
        _make_lm_head_kernel(float(eps)),
        out_shape=jax.ShapeDtypeStruct((M_pad, V_pad), out_dtype),
        grid_spec=pltpu.PrefetchScalarGridSpec(
            num_scalar_prefetch=0,
            grid=grid,
            in_specs=[
                pl.BlockSpec((tile_m, H), lambda i, j: (i, 0)),   # x rows
                pl.BlockSpec((H, H), lambda i, j: (0, 0)),        # dense W (const)
                pl.BlockSpec((1, H), lambda i, j: (0, 0)),        # dense bias
                pl.BlockSpec((1, H), lambda i, j: (0, 0)),        # LN gamma
                pl.BlockSpec((1, H), lambda i, j: (0, 0)),        # LN beta
                pl.BlockSpec((H, tile_n), lambda i, j: (0, j)),   # decoder W tile
                pl.BlockSpec((1, tile_n), lambda i, j: (0, j)),   # decoder bias tile
            ],
            out_specs=pl.BlockSpec((tile_m, tile_n), lambda i, j: (i, j)),
            scratch_shapes=[pltpu.VMEM((tile_m, H), matmul_dtype)],  # cached h
        ),
        compiler_params=pltpu.CompilerParams(
            dimension_semantics=("parallel", "arbitrary"),
            vmem_limit_bytes=64 * 1024 * 1024,
        ),
        cost_estimate=cost,
    )(x2d, w1c, b1_2d, gamma_2d, beta_2d, w2c, b2_2d)

    if M_pad != M or V_pad != V:
        out = out[:M, :V]
    return out.reshape(B, S, V)


def _reference(x, params, eps=1e-7):
    h = x @ params["w_dense"] + params["b_dense"]
    h = 0.5 * h * (1.0 + jax.lax.erf(h / jnp.sqrt(2.0)))
    mean = jnp.mean(h, axis=-1, keepdims=True)
    var = jnp.mean((h - mean) ** 2, axis=-1, keepdims=True)
    h = (h - mean) * jax.lax.rsqrt(var + eps)
    h = h * params["ln_gamma"] + params["ln_beta"]
    return h @ params["w_decoder"] + params["b_decoder"]


if __name__ == "__main__":
    eps = 1e-7
    key = jax.random.PRNGKey(0)

    def make_case(B, S, H, V, k):
        kx, k1, k2, k3, k4, k5, k6 = jax.random.split(k, 7)
        x = jax.random.normal(kx, (B, S, H), dtype=jnp.float32)
        params = {
            "w_dense": jax.random.normal(k1, (H, H), dtype=jnp.float32) * 0.02,
            "b_dense": jax.random.normal(k2, (H,), dtype=jnp.float32) * 0.1,
            "ln_gamma": 1.0 + jax.random.normal(k3, (H,), dtype=jnp.float32) * 0.1,
            "ln_beta": jax.random.normal(k4, (H,), dtype=jnp.float32) * 0.1,
            "w_decoder": jax.random.normal(k5, (H, V), dtype=jnp.float32) * 0.02,
            "b_decoder": jax.random.normal(k6, (V,), dtype=jnp.float32) * 0.1,
        }
        return x, params

    k_a, k_b = jax.random.split(key)

    # Case 1: small spec shapes (single-tile grid), f32 matmuls, tight check.
    B, S, H, V = 2, 8, 32, 64
    x, params = make_case(B, S, H, V, k_a)
    out = jax.block_until_ready(deberta_lm_prediction_head(x, params, eps=eps))
    ref = _reference(x, params, eps=eps)
    assert out.shape == (B, S, V)
    assert jnp.allclose(out, ref, atol=1e-4, rtol=1e-4), "f32 mismatch vs reference"

    # Case 2: multi-tile grid exercising M/V padding and the cached-h reuse
    # across vocab tiles, with bf16 MXU inputs + f32 accumulation/LayerNorm.
    B, S, H, V = 2, 136, 128, 320
    x, params = make_case(B, S, H, V, k_b)
    out = jax.block_until_ready(
        deberta_lm_prediction_head(x, params, eps=eps, tile_m=64, tile_n=128,
                                   matmul_dtype=jnp.bfloat16))
    ref = _reference(x, params, eps=eps)
    assert out.shape == (B, S, V)
    max_err = jnp.max(jnp.abs(out.astype(jnp.float32) - ref))
    assert max_err < 5e-2, f"bf16 mismatch vs reference (max abs err {max_err})"

    print("KERNEL_OK")
</pallas_src>

<mosaic_0001>
module attributes {stable_mosaic.version = 11 : i64} {
  func.func @kernel(%arg0: i32, %arg1: i32, %arg2: memref<16x32xf32, #tpu.memory_space<vmem>>, %arg3: memref<32x32xf32, #tpu.memory_space<vmem>>, %arg4: memref<1x32xf32, #tpu.memory_space<vmem>>, %arg5: memref<1x32xf32, #tpu.memory_space<vmem>>, %arg6: memref<1x32xf32, #tpu.memory_space<vmem>>, %arg7: memref<32x64xf32, #tpu.memory_space<vmem>>, %arg8: memref<1x64xf32, #tpu.memory_space<vmem>>, %arg9: memref<16x64xf32, #tpu.memory_space<vmem>>, %arg10: memref<16x32xf32, #tpu.memory_space<vmem>>) attributes {dimension_semantics = [#tpu.dimension_semantics<parallel>, #tpu.dimension_semantics<arbitrary>], iteration_bounds = array<i64: 1, 1>, scalar_prefetch = 0 : i64, scratch_operands = 1 : i64, tpu.core_type = #tpu.core_type<tc>, window_params = [{transform_indices = @transform_0, window_bounds = array<i64: 16, 32>}, {pipeline_mode = #tpu.pipeline_mode<synchronous>, transform_indices = @transform_1, window_bounds = array<i64: 32, 32>}, {pipeline_mode = #tpu.pipeline_mode<synchronous>, transform_indices = @transform_2, window_bounds = array<i64: 1, 32>}, {pipeline_mode = #tpu.pipeline_mode<synchronous>, transform_indices = @transform_3, window_bounds = array<i64: 1, 32>}, {pipeline_mode = #tpu.pipeline_mode<synchronous>, transform_indices = @transform_4, window_bounds = array<i64: 1, 32>}, {transform_indices = @transform_5, window_bounds = array<i64: 32, 64>}, {transform_indices = @transform_6, window_bounds = array<i64: 1, 64>}, {transform_indices = @transform_7, window_bounds = array<i64: 16, 64>}]} {
    %c0_i32 = arith.constant 0 : i32
    %0 = arith.cmpi eq, %arg1, %c0_i32 : i32
    %1 = arith.extui %0 : i1 to i32
    %c0_i32_0 = arith.constant 0 : i32
    %2 = arith.cmpi ne, %1, %c0_i32_0 : i32
    scf.if %2 {
      %c0_8 = arith.constant 0 : index
      %c0_9 = arith.constant 0 : index
      %10 = vector.load %arg2[%c0_8, %c0_9] : memref<16x32xf32, #tpu.memory_space<vmem>>, vector<16x32xf32>
      %c0_10 = arith.constant 0 : index
      %c0_11 = arith.constant 0 : index
      %11 = vector.load %arg3[%c0_10, %c0_11] : memref<32x32xf32, #tpu.memory_space<vmem>>, vector<32x32xf32>
      %cst_12 = arith.constant dense<0.000000e+00> : vector<16x32xf32>
      %12 = tpu.matmul %10, %11, %cst_12 {dimension_numbers = #tpu.dot_dimension_numbers<[1], [0], [0], [1], [0, 0, 1, 1], [], []>} : vector<16x32xf32>, vector<32x32xf32>, vector<16x32xf32> -> vector<16x32xf32>
      %c0_13 = arith.constant 0 : index
      %c0_14 = arith.constant 0 : index
      %13 = vector.load %arg4[%c0_13, %c0_14] : memref<1x32xf32, #tpu.memory_space<vmem>>, vector<1x32xf32>
      %14 = vector.broadcast %13 : vector<1x32xf32> to vector<16x32xf32>
      %15 = arith.addf %12, %14 : vector<16x32xf32>
      %cst_15 = arith.constant 5.000000e-01 : f32
      %16 = vector.broadcast %cst_15 : f32 to vector<16x32xf32>
      %17 = arith.mulf %16, %15 : vector<16x32xf32>
      %cst_16 = arith.constant 0.707106769 : f32
      %18 = vector.broadcast %cst_16 : f32 to vector<16x32xf32>
      %19 = arith.mulf %15, %18 : vector<16x32xf32>
      %20 = math.erf %19 : vector<16x32xf32>
      %cst_17 = arith.constant 1.000000e+00 : f32
      %21 = vector.broadcast %cst_17 : f32 to vector<16x32xf32>
      %22 = arith.addf %21, %20 : vector<16x32xf32>
      %23 = arith.mulf %17, %22 : vector<16x32xf32>
      %cst_18 = arith.constant dense<0.000000e+00> : vector<16xf32>
      %24 = vector.multi_reduction <add>, %23, %cst_18 [1] : vector<16x32xf32> to vector<16xf32>
      %25 = vector.shape_cast %24 : vector<16xf32> to vector<16x1xf32>
      %cst_19 = arith.constant 3.200000e+01 : f32
      %26 = vector.broadcast %cst_19 : f32 to vector<16x1xf32>
      %27 = arith.divf %25, %26 : vector<16x1xf32>
      %28 = vector.broadcast %27 : vector<16x1xf32> to vector<16x32xf32>
      %29 = arith.subf %23, %28 : vector<16x32xf32>
      %30 = arith.mulf %29, %29 : vector<16x32xf32>
      %cst_20 = arith.constant dense<0.000000e+00> : vector<16xf32>
      %31 = vector.multi_reduction <add>, %30, %cst_20 [1] : vector<16x32xf32> to vector<16xf32>
      %32 = vector.shape_cast %31 : vector<16xf32> to vector<16x1xf32>
      %cst_21 = arith.constant 3.200000e+01 : f32
      %33 = vector.broadcast %cst_21 : f32 to vector<16x1xf32>
      %34 = arith.divf %32, %33 : vector<16x1xf32>
      %cst_22 = arith.constant 1.000000e-07 : f32
      %35 = vector.broadcast %cst_22 : f32 to vector<16x1xf32>
      %36 = arith.addf %34, %35 : vector<16x1xf32>
      %37 = math.rsqrt %36 : vector<16x1xf32>
      %38 = vector.broadcast %37 : vector<16x1xf32> to vector<16x32xf32>
      %39 = arith.mulf %29, %38 : vector<16x32xf32>
      %c0_23 = arith.constant 0 : index
      %c0_24 = arith.constant 0 : index
      %40 = vector.load %arg5[%c0_23, %c0_24] : memref<1x32xf32, #tpu.memory_space<vmem>>, vector<1x32xf32>
      %41 = vector.broadcast %40 : vector<1x32xf32> to vector<16x32xf32>
      %42 = arith.mulf %39, %41 : vector<16x32xf32>
      %c0_25 = arith.constant 0 : index
      %c0_26 = arith.constant 0 : index
      %43 = vector.load %arg6[%c0_25, %c0_26] : memref<1x32xf32, #tpu.memory_space<vmem>>, vector<1x32xf32>
      %44 = vector.broadcast %43 : vector<1x32xf32> to vector<16x32xf32>
      %45 = arith.addf %42, %44 : vector<16x32xf32>
      %c0_27 = arith.constant 0 : index
      %c0_28 = arith.constant 0 : index
      %46 = vector.load %arg10[%c0_27, %c0_28] : memref<16x32xf32, #tpu.memory_space<vmem>>, vector<16x32xf32>
      tpu.vector_store %arg10[%c0_27, %c0_28], %45 {strides = array<i32>} : memref<16x32xf32, #tpu.memory_space<vmem>>, vector<16x32xf32>,
    } else {
    }
    %c0 = arith.constant 0 : index
    %c0_1 = arith.constant 0 : index
    %3 = vector.load %arg10[%c0, %c0_1] : memref<16x32xf32, #tpu.memory_space<vmem>>, vector<16x32xf32>
    %c0_2 = arith.constant 0 : index
    %c0_3 = arith.constant 0 : index
    %4 = vector.load %arg7[%c0_2, %c0_3] : memref<32x64xf32, #tpu.memory_space<vmem>>, vector<32x64xf32>
    %cst = arith.constant dense<0.000000e+00> : vector<16x64xf32>
    %5 = tpu.matmul %3, %4, %cst {dimension_numbers = #tpu.dot_dimension_numbers<[1], [0], [0], [1], [0, 0, 1, 1], [], []>} : vector<16x32xf32>, vector<32x64xf32>, vector<16x64xf32> -> vector<16x64xf32>
    %c0_4 = arith.constant 0 : index
    %c0_5 = arith.constant 0 : index
    %6 = vector.load %arg8[%c0_4, %c0_5] : memref<1x64xf32, #tpu.memory_space<vmem>>, vector<1x64xf32>
    %7 = vector.broadcast %6 : vector<1x64xf32> to vector<16x64xf32>
    %8 = arith.addf %5, %7 : vector<16x64xf32>
    %c0_6 = arith.constant 0 : index
    %c0_7 = arith.constant 0 : index
    %9 = vector.load %arg9[%c0_6, %c0_7] : memref<16x64xf32, #tpu.memory_space<vmem>>, vector<16x64xf32>
    tpu.vector_store %arg9[%c0_6, %c0_7], %8 {strides = array<i32>} : memref<16x64xf32, #tpu.memory_space<vmem>>, vector<16x64xf32>,
    return
  }
  func.func @transform_0(%arg0: i32, %arg1: i32) -> (i32, i32) {
    %c0_i32 = arith.constant 0 : i32
    %c0_i32_0 = arith.constant 0 : i32
    return %arg0, %c0_i32 : i32, i32
  }
  func.func @transform_1(%arg0: i32, %arg1: i32) -> (i32, i32) {
    %c0_i32 = arith.constant 0 : i32
    %c0_i32_0 = arith.constant 0 : i32
    %c0_i32_1 = arith.constant 0 : i32
    return %c0_i32, %c0_i32_0 : i32, i32
  }
  func.func @transform_2(%arg0: i32, %arg1: i32) -> (i32, i32) {
    %c0_i32 = arith.constant 0 : i32
    %c0_i32_0 = arith.constant 0 : i32
    %c0_i32_1 = arith.constant 0 : i32
    return %c0_i32, %c0_i32_0 : i32, i32
  }
  func.func @transform_3(%arg0: i32, %arg1: i32) -> (i32, i32) {
    %c0_i32 = arith.constant 0 : i32
    %c0_i32_0 = arith.constant 0 : i32
    %c0_i32_1 = arith.constant 0 : i32
    return %c0_i32, %c0_i32_0 : i32, i32
  }
  func.func @transform_4(%arg0: i32, %arg1: i32) -> (i32, i32) {
    %c0_i32 = arith.constant 0 : i32
    %c0_i32_0 = arith.constant 0 : i32
    %c0_i32_1 = arith.constant 0 : i32
    return %c0_i32, %c0_i32_0 : i32, i32
  }
  func.func @transform_5(%arg0: i32, %arg1: i32) -> (i32, i32) {
    %c0_i32 = arith.constant 0 : i32
    %c0_i32_0 = arith.constant 0 : i32
    return %c0_i32, %arg1 : i32, i32
  }
  func.func @transform_6(%arg0: i32, %arg1: i32) -> (i32, i32) {
    %c0_i32 = arith.constant 0 : i32
    %c0_i32_0 = arith.constant 0 : i32
    return %c0_i32, %arg1 : i32, i32
  }
  func.func @transform_7(%arg0: i32, %arg1: i32) -> (i32, i32) {
    %c0_i32 = arith.constant 0 : i32
    return %arg0, %arg1 : i32, i32
  }
}

</mosaic_0001>

<bundles_post_ra>
// kernel: tpu_custom_call.1
= control target key start
LH: loop header
LB: loop body
LE: loop exit
PB: predicated region body
PF: predicated region fallthrough
CT: control target
= control target key end

     0   :  { %12 = vsyncpa [#allocation4], 0  ;;  %s574_s0 = inlined_call_operand.hbm [shape: f32[16,32], index: 0, kind: input, shape index: {}]   ;;  %s575_s1 = inlined_call_operand.hbm [shape: f32[32,32], index: 1, kind: input, shape index: {}]   ;;  %s576_s2 = inlined_call_operand.vmem [shape: f32[1,32], index: 2, kind: input, shape index: {}]   ;;  %s577_s3 = inlined_call_operand.vmem [shape: f32[1,32], index: 3, kind: input, shape index: {}]   ;;  %s578_s4 = inlined_call_operand.vmem [shape: f32[1,32], index: 4, kind: input, shape index: {}]   ;;  %s579_s5 = inlined_call_operand.hbm [shape: f32[32,64], index: 5, kind: input, shape index: {}]   ;;  %s580_s6 = inlined_call_operand.vmem [shape: f32[1,64], index: 6, kind: input, shape index: {}]   ;;  %s581_s7 = inlined_call_operand.hbm [shape: f32[16,64], index: 7, kind: output, shape index: {}]  }
   0x1   :  { %13 = vsyncpa [#allocation7], 0 }
   0x2   :  { %14 = vsyncpa [#allocation5], 0  ;;  %s482_s24 = smov [#allocation6]   ;;  %s483_s26 = smov [#allocation3]  }
   0x3   :  { %s32_s25 = sshll.u32 %s482_s24, 4  ;;  %s20_s27 = sshll.u32 %s483_s26, 4  ;;  %s33_s25 = int_to_ptr.vmem [resolvable:$true] %s32_s25  ;;  %s21_s27 = int_to_ptr.vmem [resolvable:$true] %s20_s27 }
   0x4   :  { %s404_s28 = scalar_lea.vmem %s33_s25, 512  ;;  %p409_p1 = scmp.lt.s32.totalorder %s33_s25, %s33_s25 }
   0x5   :  { %p405_p0 = scmp.ne.s32.totalorder %s33_s25, %s404_s28  ;;  %p410_p2 = scmp.lt.s32.totalorder %s404_s28, %s404_s28 }
   0x7   :  { %p411_p3 = por %p410_p2, %p409_p1 }
   0x9   :  { %p412_p4 = pnand %p411_p3, %p405_p0 }
   0xb   :  { %415 = shalt.err (!%p412_p4)
}
   0xc   :  { %s484_s29 = smov 128   ;;  %s485_s30 = smov 8  }
   0xd   :  { %38 = dma.hbm_to_vmem [thread:$0]  %s575_s1, 512, %s33_s25, [#allocation7], %s484_s29, %s484_s29, %s485_s30  }
   0xe   :  { %s424_s10 = scalar_lea.vmem %s21_s27, 256  ;;  %p429_p6 = scmp.lt.s32.totalorder %s21_s27, %s21_s27 }
   0xf   :  { %p425_p5 = scmp.ne.s32.totalorder %s21_s27, %s424_s10  ;;  %p430_p7 = scmp.lt.s32.totalorder %s424_s10, %s424_s10 }
  0x11   :  { %p431_p8 = por %p430_p7, %p429_p6 }
  0x13   :  { %p432_p9 = pnand %p431_p8, %p425_p5 }
  0x15   :  { %435 = shalt.err (!%p432_p9)
}
  0x16   :  { %26 = dma.hbm_to_vmem [thread:$0]  %s574_s0, 256, %s21_s27, [#allocation4], %s484_s29, %s484_s29, %s485_s30  }
  0x17   :  { %s486_s13 = smov [#allocation8]  }
  0x18   :  { %s50_s14 = sshll.u32 %s486_s13, 4  ;;  %s51_s14 = int_to_ptr.vmem [resolvable:$true] %s50_s14 }
  0x19   :  { %s444_s15 = scalar_lea.vmem %s51_s14, 512  ;;  %p449_p11 = scmp.lt.s32.totalorder %s51_s14, %s51_s14 }
  0x1a   :  { %p445_p10 = scmp.ne.s32.totalorder %s51_s14, %s444_s15  ;;  %p450_p12 = scmp.lt.s32.totalorder %s444_s15, %s444_s15 }
  0x1c   :  { %p451_p13 = por %p450_p12, %p449_p11 }
  0x1e   :  { %p452_p0 = pnand %p451_p13, %p445_p10 }
  0x20   :  { %455 = shalt.err (!%p452_p0)
}
  0x21   :  { %56 = dma.hbm_to_vmem [thread:$0]  %s579_s5, 512, %s51_s14, [#allocation7], %s484_s29, %s484_s29, %s485_s30  }
  0x22   :  { %476 = dma.done.wait [#allocation4], 256  }
  0x23   :  { %477 = vsyncadd [#allocation4], 4294967040 }
  0x24   :  { %478 = dma.done.wait [#allocation7], 1024  }
  0x25   :  { %479 = vsyncadd [#allocation7], 4294966272  ;;  %vm85_vm0 = vcmask 261120   ;;  %v77_v0 = vld [vmem:[#allocation6 + $0x18] sm:$0xff]  ;;  %v76_v1 = vld [vmem:[#allocation6 + $0x10] sm:$0xff]  ;;  %vm319_vm1 = vcmask 523264  }
  0x26   :  { %360 = vmatprep.subr.mxu0 %v77_v0  ;;  %v72_v2 = vld [vmem:[#allocation3] sm:$0xff]  ;;  %v75_v3 = vld [vmem:[#allocation6 + $0x8] sm:$0xff]  ;;  %v74_v4 = vld [vmem:[#allocation6] sm:$0xff] }
  0x27   :  { %361 = vmatpush3.msra.mxu0 %v77_v0  ;;  %368 = vmatprep.mubr.msk.f32.mxu0 %vm85_vm0, %v72_v2  ;;  %v73_v5 = vld [vmem:[#allocation3 + $0x8] sm:$0xff]  ;;  %v340_v6 = vld [vmem:[%s576_s2] ss:$0 sm:$0xff]  ;;  %v228_v34 = vld [vmem:[#allocation8 + $0x10] sm:$0xff] }
  0x28   :  { %362 = vmatprep.subr.mxu0 %v76_v1  ;;  %v229_v33 = vld [vmem:[#allocation8 + $0x18] sm:$0xff]  ;;  %v227_v35 = vld [vmem:[#allocation8 + $0x8] sm:$0xff]  ;;  %v226_v36 = vld [vmem:[#allocation8] sm:$0xff] }
  0x29   :  { %363 = vmatpush3.msra.mxu0 %v76_v1  ;;  %371 = vmatprep.subr.mxu1 %v229_v33  ;;  %v343_v44 = vld [vmem:[%s577_s3] ss:$0 sm:$0xff] }
  0x2a   :  { %364 = vmatprep.subr.mxu0 %v75_v3  ;;  %372 = vmatpush3.msra.mxu1 %v229_v33  ;;  %v344_v46 = vld [vmem:[%s578_s4] ss:$0 sm:$0xff]  ;;  %s487_s4 = smov [#allocation9]  }
  0x2b   :  { %365 = vmatpush3.msra.mxu0 %v75_v3  ;;  %373 = vmatprep.subr.mxu1 %v228_v34  ;;  %v345_v55 = vld [vmem:[%s580_s6] ss:$0 sm:$0xff]  ;;  %s327_s21 = sshll.u32 %s487_s4, 4  ;;  %s328_s21 = int_to_ptr.vmem [resolvable:$true] %s327_s21 }
  0x2c   :  { %366 = vmatprep.subr.mxu0 %v74_v4  ;;  %374 = vmatpush3.msra.mxu1 %v228_v34  ;;  %s456_s22 = scalar_lea.vmem %s328_s21, 256  ;;  %p461_p2 = scmp.lt.s32.totalorder %s328_s21, %s328_s21 }
  0x2d   :  { %367 = vmatpush3.msra.mxu0 %v74_v4  ;;  %375 = vmatprep.subr.mxu1 %v227_v35  ;;  %p457_p1 = scmp.ne.s32.totalorder %s328_s21, %s456_s22  ;;  %p462_p3 = scmp.lt.s32.totalorder %s456_s22, %s456_s22 }
  0x2e   :  { %369 = vmatmul.mubr.msk.f32.vlgmr.msra.gmra.mxu0 %vm85_vm0, %v73_v5  ;;  %376 = vmatpush3.msra.mxu1 %v227_v35 }
  0x2f   :  { %377 = vmatprep.subr.mxu1 %v226_v36  ;;  %p463_p4 = por %p462_p3, %p461_p2 }
  0x30   :  { %378 = vmatpush3.msra.mxu1 %v226_v36 }
  0x31   :  { %p464_p5 = pnand %p463_p4, %p457_p1 }
  0xee   :  { %v370_v7 = vpop.f32.mrf.mxu0 }
  0xef   :  { %v164_v8 = vadd.f32 %v370_v7, %v340_v6 }
  0xf0   :  { %v158_v9 = vpop.f32.mrf.mxu0 }
  0xf1   :  { %v170_v10 = vmul.f32 0.70710677, %v164_v8  ;;  %v159_v11 = vadd.f32 %v340_v6, %v158_v9  ;;  %v168_v18 = vmul.f32 0.5, %v164_v8 }
  0xf3   :  { %388 = verf.f32 %v170_v10  ;;  %v169_v12 = vmul.f32 0.70710677, %v159_v11  ;;  %v167_v15 = vmul.f32 0.5, %v159_v11 }
  0xf5   :  { %390 = verf.f32 %v169_v12 }
 0x100   :  { %v389_v13 = vpop.eup %388 }
 0x101   :  { %v174_v17 = vadd.f32 1.0, %v389_v13 }
 0x102   :  { %v391_v14 = vpop.eup %390 }
 0x103   :  { %v173_v16 = vadd.f32 1.0, %v391_v14  ;;  %v176_v21 = vmul.f32 %v174_v17, %v168_v18 }
 0x105   :  { %v175_v19 = vmul.f32 %v173_v16, %v167_v15  ;;  %v180_v22 = vsel %vm85_vm0, %v176_v21, 0.0 }
 0x107   :  { %v177_v20 = vsel %vm85_vm0, %v175_v19, 0.0 }
 0x108   :  { %178 = vadd.xlane.f32.xlu0 %v177_v20 }
 0x10c   :  { %181 = vadd.xlane.f32.xlu0 %v180_v22 }
 0x191   :  { %v179_v23 = vpop.xlane.xlu0 %178 }
 0x192   :  { %v184_v24 = vmul.f32 0.03125, %v179_v23 }
 0x194   :  { %v186_v25 = vsub.f32 %v175_v19, %v184_v24 }
 0x195   :  { %v182_v26 = vpop.xlane.xlu0 %181 }
 0x196   :  { %v185_v27 = vmul.f32 0.03125, %v182_v26  ;;  %v188_v28 = vmul.f32 %v186_v25, %v186_v25 }
 0x198   :  { %v187_v29 = vsub.f32 %v176_v21, %v185_v27  ;;  %v190_v30 = vsel %vm85_vm0, %v188_v28, 0.0 }
 0x199   :  { %191 = vadd.xlane.f32.xlu1 %v190_v30 }
 0x19a   :  { %v189_v31 = vmul.f32 %v187_v29, %v187_v29 }
 0x19c   :  { %v193_v32 = vsel %vm85_vm0, %v189_v31, 0.0 }
 0x19d   :  { %194 = vadd.xlane.f32.xlu1 %v193_v32 }
 0x222   :  { %v192_v37 = vpop.xlane.xlu1 %191 }
 0x223   :  { %v196_v38 = vmul.f32 0.03125, %v192_v37 }
 0x225   :  { %v198_v39 = vadd.f32 1e-07, %v196_v38 }
 0x226   :  { %v195_v40 = vpop.xlane.xlu1 %194 }
 0x227   :  { %392 = vrsqrt.f32 %v198_v39  ;;  %v197_v41 = vmul.f32 0.03125, %v195_v40 }
 0x229   :  { %v199_v42 = vadd.f32 1e-07, %v197_v41 }
 0x22b   :  { %394 = vrsqrt.f32 %v199_v42 }
 0x234   :  { %v393_v43 = vpop.eup %392 }
 0x235   :  { %v202_v45 = vmul.f32 %v393_v43, %v186_v25 }
 0x237   :  { %v211_v47 = vmul.f32 %v343_v44, %v202_v45 }
 0x238   :  { %v395_v48 = vpop.eup %394 }
 0x239   :  { %v220_v49 = vadd.f32 %v344_v46, %v211_v47  ;;  %v203_v50 = vmul.f32 %v395_v48, %v187_v29 }
 0x23b   :  { %222 = vst.msk [vmem:[#allocation2] sm:$0xff] %vm85_vm0, %v220_v49  ;;  %v212_v51 = vmul.f32 %v343_v44, %v203_v50 }
 0x23d   :  { %v221_v52 = vadd.f32 %v344_v46, %v212_v51 }
 0x23f   :  { %223 = vst.msk [vmem:[#allocation2 + $0x8] sm:$0xff] %vm85_vm0, %v221_v52 }
 0x242   :  { %v224_v53 = vld [vmem:[#allocation2] sm:$0xff] }
 0x243   :  { %379 = vmatprep.mubr.msk.f32.mxu1 %vm85_vm0, %v224_v53 }
 0x246   :  { %v225_v54 = vld [vmem:[#allocation2 + $0x8] sm:$0xff] }
 0x247   :  { %380 = vmatmul.mubr.msk.f32.vlgmr.msra.gmra.mxu1 %vm85_vm0, %v225_v54 }
 0x307   :  { %v381_v56 = vpop.f32.mrf.mxu1 }
 0x308   :  { %v316_v57 = vadd.f32 %v381_v56, %v345_v55 }
 0x309   :  { %v310_v58 = vpop.f32.mrf.mxu1 }
 0x30a   :  { %v311_v59 = vadd.f32 %v345_v55, %v310_v58  ;;  %321 = vst.msk [vmem:[#allocation9 + $0x8] sm:$0xff] %vm319_vm1, %v316_v57 }
 0x30c   :  { %320 = vst.msk [vmem:[#allocation9] sm:$0xff] %vm319_vm1, %v311_v59 }
 0x30d   :  { %467 = shalt.err (!%p464_p5)
}
 0x30e   :  { %333 = dma.vmem_to_hbm [thread:$0]  %s328_s21, 256, %s581_s7, [#allocation5], %s484_s29, %s484_s29, %s485_s30  }
 0x30f   :  { %480 = dma.done.wait [#allocation5], 256  }
 0x310   :  { %481 = vsyncadd [#allocation5], 4294967040 }
 0x311   :  { %337 = vsyncpa [#allocation4], 1 }
 0x312   :  { %338 = vsyncpa [#allocation7], 1 }
 0x313   :  { %339 = vsyncpa [#allocation5], 1 }

</bundles_post_ra>
